<compile_context>
chip_gen: v5e
topology: v5e:2x2
jax: 0.10.0
libtpu: 0.0.40
codegen_flags: <defaults>
</compile_context>

<pallas_src>
import jax
import jax.numpy as jnp
from jax.experimental import pallas as pl
from jax.experimental.pallas import tpu as pltpu

_LANES = 128
_MAX_COL_FACTOR = 32                      # cols <= 128 * 32 = 4096
_MAX_BLOCK_BYTES = int(3.5 * 1024 * 1024)  # v5e-safe: 4x block (dbl-buf in+out) < 16 MiB


def _relu_kernel(x_ref, o_ref):
    o_ref[...] = jnp.maximum(x_ref[...], 0)


def _sublane_multiple(dtype):
    """Rows-per-packed-sublane multiple: 8 for f32, 16 for bf16, 32 for int8/fp8."""
    itemsize = jnp.dtype(dtype).itemsize
    return max(8, 32 // itemsize)


def _pick_blocks(rows, cols, itemsize, sublane):
    """Fewest grid steps whose block fits the byte cap.

    Returns (grid_n, block_rows) or (None, None) if no legal tiling exists for
    this (rows, cols) factorization.
    """
    if rows * cols * itemsize <= _MAX_BLOCK_BYTES:
        return 1, rows  # single full-extent block: always legal
    for g in range(2, rows + 1):
        if rows % g:
            continue
        block_rows = rows // g
        if block_rows % sublane:
            continue
        if block_rows * cols * itemsize <= _MAX_BLOCK_BYTES:
            return g, block_rows
    return None, None


def _choose_layout(total, itemsize, sublane):
    """Pad + reshape plan: (padded_total, rows, cols, grid_n, block_rows)."""
    lane_block = sublane * _LANES
    padded = ((total + lane_block - 1) // lane_block) * lane_block
    rows0 = padded // _LANES  # guaranteed multiple of `sublane`

    # Widest lane-dense cols first; fall back to narrower if no legal tiling.
    w = _MAX_COL_FACTOR
    while w >= 1:
        if rows0 % w == 0:
            cols = _LANES * w
            rows = rows0 // w
            grid_n, block_rows = _pick_blocks(rows, cols, itemsize, sublane)
            if grid_n is not None:
                return padded, rows, cols, grid_n, block_rows
        w //= 2
    # Unreachable: w == 1 (cols = 128, rows multiple of sublane) always tiles.
    raise AssertionError("no legal tiling found")


def relu_pallas(x):
    """Elementwise ReLU on an arbitrary-shaped tensor via a Pallas TPU kernel."""
    orig_shape = x.shape
    dtype = x.dtype
    itemsize = jnp.dtype(dtype).itemsize
    sublane = _sublane_multiple(dtype)
    total = x.size

    padded, rows, cols, grid_n, block_rows = _choose_layout(total, itemsize, sublane)

    flat = x.reshape(-1)
    pad = padded - total
    if pad:
        flat = jnp.pad(flat, (0, pad))
    x2d = flat.reshape(rows, cols)

    block_bytes = block_rows * cols * itemsize
    # Double-buffered input + output blocks, plus headroom; cap at v5e's default.
    vmem_bytes = min(4 * block_bytes + (1 << 20), 16 * 1024 * 1024)

    out2d = pl.pallas_call(
        _relu_kernel,
        out_shape=jax.ShapeDtypeStruct((rows, cols), dtype),
        grid_spec=pl.GridSpec(
            grid=(grid_n,),
            in_specs=[pl.BlockSpec((block_rows, cols), lambda i: (i, 0))],
            out_specs=pl.BlockSpec((block_rows, cols), lambda i: (i, 0)),
        ),
        compiler_params=pltpu.CompilerParams(
            dimension_semantics=("parallel",),
            vmem_limit_bytes=vmem_bytes,
        ),
        cost_estimate=pl.CostEstimate(
            flops=padded,
            transcendentals=0,
            bytes_accessed=2 * padded * itemsize,
        ),
    )(x2d)

    out_flat = out2d.reshape(-1)
    if pad:
        out_flat = out_flat[:total]
    return out_flat.reshape(orig_shape)


if __name__ == "__main__":
    key = jax.random.PRNGKey(0)
    # Small shape consistent with the module's NCHW activation input.
    x = jax.random.normal(key, (2, 4, 16, 16), dtype=jnp.float32)
    ref = jnp.maximum(x, 0.0)

    out = jax.block_until_ready(relu_pallas(x))
    assert out.shape == x.shape
    assert jnp.allclose(out, ref), "Pallas ReLU mismatch vs reference"

    # Exercise the padded (non-128-divisible) path as well.
    x_odd = jax.random.normal(jax.random.PRNGKey(1), (2, 3, 5, 7), dtype=jnp.float32)
    out_odd = jax.block_until_ready(relu_pallas(x_odd))
    assert out_odd.shape == x_odd.shape
    assert jnp.allclose(out_odd, jnp.maximum(x_odd, 0.0)), "padded-path mismatch"

    print("KERNEL_OK")
</pallas_src>

<mosaic_0001>
module attributes {stable_mosaic.version = 11 : i64} {
  func.func @_relu_kernel(%arg0: i32, %arg1: memref<1x2048xf32, #tpu.memory_space<vmem>>, %arg2: memref<1x2048xf32, #tpu.memory_space<vmem>>) attributes {dimension_semantics = [#tpu.dimension_semantics<parallel>], iteration_bounds = array<i64: 1>, scalar_prefetch = 0 : i64, scratch_operands = 0 : i64, tpu.core_type = #tpu.core_type<tc>, window_params = [{transform_indices = @transform_0, window_bounds = array<i64: 1, 2048>}, {transform_indices = @transform_1, window_bounds = array<i64: 1, 2048>}]} {
    %c0 = arith.constant 0 : index
    %c0_0 = arith.constant 0 : index
    %0 = vector.load %arg1[%c0, %c0_0] : memref<1x2048xf32, #tpu.memory_space<vmem>>, vector<1x2048xf32>
    %cst = arith.constant 0.000000e+00 : f32
    %1 = vector.broadcast %cst : f32 to vector<1x2048xf32>
    %2 = arith.maximumf %0, %1 : vector<1x2048xf32>
    %c0_1 = arith.constant 0 : index
    %c0_2 = arith.constant 0 : index
    %3 = vector.load %arg2[%c0_1, %c0_2] : memref<1x2048xf32, #tpu.memory_space<vmem>>, vector<1x2048xf32>
    tpu.vector_store %arg2[%c0_1, %c0_2], %2 {strides = array<i32>} : memref<1x2048xf32, #tpu.memory_space<vmem>>, vector<1x2048xf32>,
    return
  }
  func.func @transform_0(%arg0: i32) -> (i32, i32) {
    %c0_i32 = arith.constant 0 : i32
    %c0_i32_0 = arith.constant 0 : i32
    return %arg0, %c0_i32 : i32, i32
  }
  func.func @transform_1(%arg0: i32) -> (i32, i32) {
    %c0_i32 = arith.constant 0 : i32
    %c0_i32_0 = arith.constant 0 : i32
    return %arg0, %c0_i32 : i32, i32
  }
}

</mosaic_0001>

<bundles_post_ra>
// kernel: tpu_custom_call.1
= control target key start
LH: loop header
LB: loop body
LE: loop exit
PB: predicated region body
PF: predicated region fallthrough
CT: control target
= control target key end

     0   :  { %6 = vsyncpa [#allocation3], 0  ;;  %s118_s0 = inlined_call_operand.hbm [shape: f32[1,2048], index: 0, kind: input, shape index: {}]   ;;  %s119_s1 = inlined_call_operand.hbm [shape: f32[1,2048], index: 1, kind: output, shape index: {}]  }
   0x1   :  { %7 = vsyncpa [#allocation4], 0  ;;  %s13_s8 = sshll.u32 %s118_s0, 4  ;;  %s100_s9 = smov [#allocation2]   ;;  %s14_s8 = int_to_ptr.hbm [resolvable:$true] %s13_s8 }
   0x2   :  { %s15_s10 = sshll.u32 %s100_s9, 4  ;;  %s16_s10 = int_to_ptr.vmem [resolvable:$true] %s15_s10 }
   0x3   :  { %18 = dma.hbm_to_vmem [thread:$0]  %s14_s8, 256, %s16_s10, [#allocation3]  }
   0x4   :  { %96 = dma.done.wait [#allocation3], 256  }
   0x5   :  { %97 = vsyncadd [#allocation3], 4294967040  ;;  %s101_s11 = smov [#allocation5]   ;;  %s36_s15 = sshll.u32 %s119_s1, 4  ;;  %v23_v0 = vld [vmem:[#allocation2] sm:$0xff]  ;;  %v24_v1 = vld [vmem:[#allocation2 + $0x8] sm:$0xff]  ;;  %s37_s15 = int_to_ptr.hbm [resolvable:$true] %s36_s15 }
   0x6   :  { %s34_s12 = sshll.u32 %s101_s11, 4  ;;  %v25_v2 = vmax.f32 %v23_v0, 0.0  ;;  %v26_v3 = vmax.f32 %v24_v1, 0.0  ;;  %s35_s12 = int_to_ptr.vmem [resolvable:$true] %s34_s12 }
   0x8   :  { %27 = vst [vmem:[#allocation5] sm:$0xff] %v25_v2 }
   0x9   :  { %28 = vst [vmem:[#allocation5 + $0x8] sm:$0xff] %v26_v3 }
   0xa   :  { %39 = dma.vmem_to_hbm [thread:$0]  %s35_s12, 256, %s37_s15, [#allocation4]  }
   0xb   :  { %98 = dma.done.wait [#allocation4], 256  }
   0xc   :  { %99 = vsyncadd [#allocation4], 4294967040 }
   0xd   :  { %44 = vsyncpa [#allocation3], 1 }
   0xe   :  { %45 = vsyncpa [#allocation4], 1 }

</bundles_post_ra>
